<compile_context>
chip_gen: v7x
topology: tpu7x:2x2x1
jax: 0.10.0
libtpu: 0.0.40
codegen_flags: <defaults>
</compile_context>

<pallas_src>
import jax
import jax.numpy as jnp
from jax.experimental import pallas as pl
from jax.experimental.pallas import tpu as pltpu


def _round_up(x, m):
    return ((x + m - 1) // m) * m


def _cdiv(a, b):
    return (a + b - 1) // b


def sae_kernel(x_ref, w1_ref, b1_ref, w2_ref, b2_ref,
               w3_ref, b3_ref, w4_ref, b4_ref, o_ref):
    """Fused 4-layer auto-encoder forward for one (TILE_B, nb_movies) batch tile.

    x_ref:  (TILE_B, nb_movies) f32   (cast to bf16 in-kernel)
    wN_ref: (in_N, out_N)       bf16   bN_ref: (1, out_N) f32
    o_ref:  (TILE_B, nb_movies) bf16
    """
    bf = jnp.bfloat16
    x = x_ref[...].astype(bf)                         # f32 -> bf16 inside the kernel

    # fc1 + sigmoid (MXU bf16 -> f32 accum; activation in f32 on VPU/EUP)
    h = jnp.dot(x, w1_ref[...], preferred_element_type=jnp.float32) + b1_ref[...]
    h = jax.nn.sigmoid(h)

    # fc2 + sigmoid
    h = jnp.dot(h.astype(bf), w2_ref[...], preferred_element_type=jnp.float32) + b2_ref[...]
    h = jax.nn.sigmoid(h)

    # fc3 + sigmoid
    h = jnp.dot(h.astype(bf), w3_ref[...], preferred_element_type=jnp.float32) + b3_ref[...]
    h = jax.nn.sigmoid(h)

    # fc4 (no activation)
    out = jnp.dot(h.astype(bf), w4_ref[...], preferred_element_type=jnp.float32) + b4_ref[...]
    o_ref[...] = out.astype(o_ref.dtype)


def _choose_tile_b(B, nb_movies, desired=512):
    """Adaptive batch tile: minimal padding, >=2 grid steps when splittable,
    capped by a ~40 MiB VMEM budget for the double-buffered x/out tiles."""
    n_steps = max(1, _cdiv(B, desired))
    if n_steps == 1 and B > 8:
        n_steps = 2                      # let the 'parallel' axis shard across v7x's 2 TCs
    tile_b = _round_up(_cdiv(B, n_steps), 8)
    per_row = 2 * nb_movies * (4 + 2)    # double-buffered: x f32 in + out bf16
    cap = max(8, (40 * 1024 * 1024 // per_row) // 8 * 8)
    return max(8, min(tile_b, cap))


def sae_forward(x, params, *, desired_tile_b=512):
    """Batch-gridded, VMEM-resident-weight SAE forward.

    x:      (B, nb_movies) f32 ratings
    params: list of (W, b) with W:(in, out) f32, b:(1, out) f32
    returns (B, nb_movies) bf16
    """
    (w1, b1), (w2, b2), (w3, b3), (w4, b4) = params
    B, nb_movies = x.shape
    h1, h2 = w1.shape[1], w2.shape[1]            # 20, 10

    bf = jnp.bfloat16
    # Weights are tiny; one-time bf16 cast in the wrapper is negligible HBM traffic.
    w1b, w2b, w3b, w4b = (w.astype(bf) for w in (w1, w2, w3, w4))

    tile_b = _choose_tile_b(B, nb_movies, desired_tile_b)
    grid = (_cdiv(B, tile_b),)

    # VMEM budget / scoped limit.
    io_vmem = 2 * tile_b * nb_movies * (4 + 2)
    weight_hbm = ((w1b.size + w2b.size + w3b.size + w4b.size) * 2
                  + (b1.size + b2.size + b3.size + b4.size) * 4)
    vmem_limit = int(min(48 * 1024 * 1024,
                         max(32 * 1024 * 1024, io_vmem + 2 * weight_hbm + (2 << 20))))

    flops = 2 * B * (nb_movies * h1 + h1 * h2 + h2 * h1 + h1 * nb_movies)
    transcendentals = B * (h1 + h2 + h1)
    bytes_accessed = B * nb_movies * (4 + 2) + weight_hbm

    def build(single_buffer_weights):
        def resident(shape):
            idx = lambda i, _shape=shape: tuple(0 for _ in _shape)
            if single_buffer_weights:
                # Constant index_map -> no re-DMA; single buffer halves resident VMEM.
                return pl.BlockSpec(shape, idx, pipeline_mode=pl.Buffered(1))
            return pl.BlockSpec(shape, idx)

        in_specs = [
            pl.BlockSpec((tile_b, nb_movies), lambda i: (i, 0)),   # x tile (pipelined)
            resident((nb_movies, h1)),                             # w1
            resident((1, h1)),                                     # b1
            resident((h1, h2)),                                    # w2
            resident((1, h2)),                                     # b2
            resident((h2, h1)),                                    # w3
            resident((1, h1)),                                     # b3
            resident((h1, nb_movies)),                             # w4
            resident((1, nb_movies)),                              # b4
        ]
        out_spec = pl.BlockSpec((tile_b, nb_movies), lambda i: (i, 0))

        return pl.pallas_call(
            sae_kernel,
            out_shape=jax.ShapeDtypeStruct((B, nb_movies), jnp.bfloat16),
            grid=grid,
            in_specs=in_specs,
            out_specs=out_spec,
            compiler_params=pltpu.CompilerParams(
                dimension_semantics=("parallel",),
                vmem_limit_bytes=vmem_limit),
            cost_estimate=pl.CostEstimate(
                flops=int(flops),
                transcendentals=int(transcendentals),
                bytes_accessed=int(bytes_accessed)),
        )

    args = (x, w1b, b1, w2b, b2, w3b, b3, w4b, b4)
    try:
        out = build(single_buffer_weights=True)(*args)
        out = jax.block_until_ready(out)
    except Exception:
        # Fallback if single-buffered pipeline_mode is not supported by this JAX version.
        out = build(single_buffer_weights=False)(*args)
    return out


def init_params(key, nb_movies):
    """Deterministic init matching PyTorch Linear shapes.

    PyTorch nn.Linear(in, out) holds W:(out, in), b:(out,); we store W
    transposed as (in, out) and b as (1, out) for the y = x @ W + b layout.
    """
    dims = [(nb_movies, 20), (20, 10), (10, 20), (20, nb_movies)]
    params = []
    for (fan_in, fan_out) in dims:
        key, kw, kb = jax.random.split(key, 3)
        bound = 1.0 / jnp.sqrt(fan_in)  # PyTorch default Linear init range
        w = jax.random.uniform(kw, (fan_in, fan_out), jnp.float32, -bound, bound)
        b = jax.random.uniform(kb, (1, fan_out), jnp.float32, -bound, bound)
        params.append((w, b))
    return params


def sae_reference(x, params):
    """Pure-JAX reference mirroring the kernel's bf16-matmul / f32-accum math."""
    (w1, b1), (w2, b2), (w3, b3), (w4, b4) = params
    bf = jnp.bfloat16
    h = jax.nn.sigmoid(jnp.dot(x.astype(bf), w1.astype(bf),
                               preferred_element_type=jnp.float32) + b1)
    h = jax.nn.sigmoid(jnp.dot(h.astype(bf), w2.astype(bf),
                               preferred_element_type=jnp.float32) + b2)
    h = jax.nn.sigmoid(jnp.dot(h.astype(bf), w3.astype(bf),
                               preferred_element_type=jnp.float32) + b3)
    return jnp.dot(h.astype(bf), w4.astype(bf),
                   preferred_element_type=jnp.float32) + b4


if __name__ == "__main__":
    B = 8            # small batch of users
    NB_MOVIES = 200  # synthetic "nb_movies" (non-128-multiple feature dim)

    key = jax.random.PRNGKey(0)
    key, kx = jax.random.split(key)
    # Ratings in [0, 5], many zeros like the real dataset.
    x = jax.random.uniform(kx, (B, NB_MOVIES), jnp.float32, 0.0, 5.0)
    x = jnp.where(x < 2.5, 0.0, x)

    params = init_params(key, NB_MOVIES)

    out = sae_forward(x, params)
    out = jax.block_until_ready(out)

    ref = sae_reference(x, params)
    assert out.shape == (B, NB_MOVIES)
    assert out.dtype == jnp.bfloat16
    assert jnp.allclose(out.astype(jnp.float32), ref, atol=2e-2, rtol=1e-2), \
        "mismatch vs reference"

    print("KERNEL_OK")
</pallas_src>

<mosaic_0001>
module attributes {stable_mosaic.version = 11 : i64} {
  func.func @sae_kernel(%arg0: i32, %arg1: memref<8x200xf32, #tpu.memory_space<vmem>>, %arg2: memref<200x20xbf16, #tpu.memory_space<vmem>>, %arg3: memref<1x20xf32, #tpu.memory_space<vmem>>, %arg4: memref<20x10xbf16, #tpu.memory_space<vmem>>, %arg5: memref<1x10xf32, #tpu.memory_space<vmem>>, %arg6: memref<10x20xbf16, #tpu.memory_space<vmem>>, %arg7: memref<1x20xf32, #tpu.memory_space<vmem>>, %arg8: memref<20x200xbf16, #tpu.memory_space<vmem>>, %arg9: memref<1x200xf32, #tpu.memory_space<vmem>>, %arg10: memref<8x200xbf16, #tpu.memory_space<vmem>>) attributes {dimension_semantics = [#tpu.dimension_semantics<parallel>], iteration_bounds = array<i64: 1>, scalar_prefetch = 0 : i64, scratch_operands = 0 : i64, tpu.core_type = #tpu.core_type<tc>, window_params = [{transform_indices = @transform_0, window_bounds = array<i64: 8, 200>}, {pipeline_mode = #tpu.pipeline_mode<synchronous>, transform_indices = @transform_1, window_bounds = array<i64: 200, 20>}, {pipeline_mode = #tpu.pipeline_mode<synchronous>, transform_indices = @transform_2, window_bounds = array<i64: 1, 20>}, {pipeline_mode = #tpu.pipeline_mode<synchronous>, transform_indices = @transform_3, window_bounds = array<i64: 20, 10>}, {pipeline_mode = #tpu.pipeline_mode<synchronous>, transform_indices = @transform_4, window_bounds = array<i64: 1, 10>}, {pipeline_mode = #tpu.pipeline_mode<synchronous>, transform_indices = @transform_5, window_bounds = array<i64: 10, 20>}, {pipeline_mode = #tpu.pipeline_mode<synchronous>, transform_indices = @transform_6, window_bounds = array<i64: 1, 20>}, {pipeline_mode = #tpu.pipeline_mode<synchronous>, transform_indices = @transform_7, window_bounds = array<i64: 20, 200>}, {pipeline_mode = #tpu.pipeline_mode<synchronous>, transform_indices = @transform_8, window_bounds = array<i64: 1, 200>}, {transform_indices = @transform_9, window_bounds = array<i64: 8, 200>}]} {
    %c0 = arith.constant 0 : index
    %c0_0 = arith.constant 0 : index
    %0 = vector.load %arg1[%c0, %c0_0] : memref<8x200xf32, #tpu.memory_space<vmem>>, vector<8x200xf32>
    %1 = arith.truncf %0 : vector<8x200xf32> to vector<8x200xbf16>
    %c0_1 = arith.constant 0 : index
    %c0_2 = arith.constant 0 : index
    %2 = vector.load %arg2[%c0_1, %c0_2] : memref<200x20xbf16, #tpu.memory_space<vmem>>, vector<200x20xbf16>
    %cst = arith.constant dense<0.000000e+00> : vector<8x20xf32>
    %3 = tpu.matmul %1, %2, %cst {dimension_numbers = #tpu.dot_dimension_numbers<[1], [0], [0], [1], [0, 0, 1, 1], [], []>} : vector<8x200xbf16>, vector<200x20xbf16>, vector<8x20xf32> -> vector<8x20xf32>
    %c0_3 = arith.constant 0 : index
    %c0_4 = arith.constant 0 : index
    %4 = vector.load %arg3[%c0_3, %c0_4] : memref<1x20xf32, #tpu.memory_space<vmem>>, vector<1x20xf32>
    %5 = vector.broadcast %4 : vector<1x20xf32> to vector<8x20xf32>
    %6 = arith.addf %3, %5 : vector<8x20xf32>
    %7 = arith.negf %6 : vector<8x20xf32>
    %8 = math.exp %7 : vector<8x20xf32>
    %cst_5 = arith.constant 1.000000e+00 : f32
    %9 = vector.broadcast %cst_5 : f32 to vector<8x20xf32>
    %10 = arith.addf %9, %8 : vector<8x20xf32>
    %11 = arith.divf %9, %10 : vector<8x20xf32>
    %12 = arith.truncf %11 : vector<8x20xf32> to vector<8x20xbf16>
    %c0_6 = arith.constant 0 : index
    %c0_7 = arith.constant 0 : index
    %13 = vector.load %arg4[%c0_6, %c0_7] : memref<20x10xbf16, #tpu.memory_space<vmem>>, vector<20x10xbf16>
    %cst_8 = arith.constant dense<0.000000e+00> : vector<8x10xf32>
    %14 = tpu.matmul %12, %13, %cst_8 {dimension_numbers = #tpu.dot_dimension_numbers<[1], [0], [0], [1], [0, 0, 1, 1], [], []>} : vector<8x20xbf16>, vector<20x10xbf16>, vector<8x10xf32> -> vector<8x10xf32>
    %c0_9 = arith.constant 0 : index
    %c0_10 = arith.constant 0 : index
    %15 = vector.load %arg5[%c0_9, %c0_10] : memref<1x10xf32, #tpu.memory_space<vmem>>, vector<1x10xf32>
    %16 = vector.broadcast %15 : vector<1x10xf32> to vector<8x10xf32>
    %17 = arith.addf %14, %16 : vector<8x10xf32>
    %18 = arith.negf %17 : vector<8x10xf32>
    %19 = math.exp %18 : vector<8x10xf32>
    %cst_11 = arith.constant 1.000000e+00 : f32
    %20 = vector.broadcast %cst_11 : f32 to vector<8x10xf32>
    %21 = arith.addf %20, %19 : vector<8x10xf32>
    %22 = arith.divf %20, %21 : vector<8x10xf32>
    %23 = arith.truncf %22 : vector<8x10xf32> to vector<8x10xbf16>
    %c0_12 = arith.constant 0 : index
    %c0_13 = arith.constant 0 : index
    %24 = vector.load %arg6[%c0_12, %c0_13] : memref<10x20xbf16, #tpu.memory_space<vmem>>, vector<10x20xbf16>
    %cst_14 = arith.constant dense<0.000000e+00> : vector<8x20xf32>
    %25 = tpu.matmul %23, %24, %cst_14 {dimension_numbers = #tpu.dot_dimension_numbers<[1], [0], [0], [1], [0, 0, 1, 1], [], []>} : vector<8x10xbf16>, vector<10x20xbf16>, vector<8x20xf32> -> vector<8x20xf32>
    %c0_15 = arith.constant 0 : index
    %c0_16 = arith.constant 0 : index
    %26 = vector.load %arg7[%c0_15, %c0_16] : memref<1x20xf32, #tpu.memory_space<vmem>>, vector<1x20xf32>
    %27 = vector.broadcast %26 : vector<1x20xf32> to vector<8x20xf32>
    %28 = arith.addf %25, %27 : vector<8x20xf32>
    %29 = arith.negf %28 : vector<8x20xf32>
    %30 = math.exp %29 : vector<8x20xf32>
    %cst_17 = arith.constant 1.000000e+00 : f32
    %31 = vector.broadcast %cst_17 : f32 to vector<8x20xf32>
    %32 = arith.addf %31, %30 : vector<8x20xf32>
    %33 = arith.divf %31, %32 : vector<8x20xf32>
    %34 = arith.truncf %33 : vector<8x20xf32> to vector<8x20xbf16>
    %c0_18 = arith.constant 0 : index
    %c0_19 = arith.constant 0 : index
    %35 = vector.load %arg8[%c0_18, %c0_19] : memref<20x200xbf16, #tpu.memory_space<vmem>>, vector<20x200xbf16>
    %cst_20 = arith.constant dense<0.000000e+00> : vector<8x200xf32>
    %36 = tpu.matmul %34, %35, %cst_20 {dimension_numbers = #tpu.dot_dimension_numbers<[1], [0], [0], [1], [0, 0, 1, 1], [], []>} : vector<8x20xbf16>, vector<20x200xbf16>, vector<8x200xf32> -> vector<8x200xf32>
    %c0_21 = arith.constant 0 : index
    %c0_22 = arith.constant 0 : index
    %37 = vector.load %arg9[%c0_21, %c0_22] : memref<1x200xf32, #tpu.memory_space<vmem>>, vector<1x200xf32>
    %38 = vector.broadcast %37 : vector<1x200xf32> to vector<8x200xf32>
    %39 = arith.addf %36, %38 : vector<8x200xf32>
    %40 = arith.truncf %39 : vector<8x200xf32> to vector<8x200xbf16>
    %c0_23 = arith.constant 0 : index
    %c0_24 = arith.constant 0 : index
    %41 = vector.load %arg10[%c0_23, %c0_24] : memref<8x200xbf16, #tpu.memory_space<vmem>>, vector<8x200xbf16>
    tpu.vector_store %arg10[%c0_23, %c0_24], %40 {strides = array<i32>} : memref<8x200xbf16, #tpu.memory_space<vmem>>, vector<8x200xbf16>,
    return
  }
  func.func @transform_0(%arg0: i32) -> (i32, i32) {
    %c0_i32 = arith.constant 0 : i32
    %c0_i32_0 = arith.constant 0 : i32
    return %arg0, %c0_i32 : i32, i32
  }
  func.func @transform_1(%arg0: i32) -> (i32, i32) {
    %c0_i32 = arith.constant 0 : i32
    %c0_i32_0 = arith.constant 0 : i32
    %c0_i32_1 = arith.constant 0 : i32
    return %c0_i32, %c0_i32_0 : i32, i32
  }
  func.func @transform_2(%arg0: i32) -> (i32, i32) {
    %c0_i32 = arith.constant 0 : i32
    %c0_i32_0 = arith.constant 0 : i32
    %c0_i32_1 = arith.constant 0 : i32
    return %c0_i32, %c0_i32_0 : i32, i32
  }
  func.func @transform_3(%arg0: i32) -> (i32, i32) {
    %c0_i32 = arith.constant 0 : i32
    %c0_i32_0 = arith.constant 0 : i32
    %c0_i32_1 = arith.constant 0 : i32
    return %c0_i32, %c0_i32_0 : i32, i32
  }
  func.func @transform_4(%arg0: i32) -> (i32, i32) {
    %c0_i32 = arith.constant 0 : i32
    %c0_i32_0 = arith.constant 0 : i32
    %c0_i32_1 = arith.constant 0 : i32
    return %c0_i32, %c0_i32_0 : i32, i32
  }
  func.func @transform_5(%arg0: i32) -> (i32, i32) {
    %c0_i32 = arith.constant 0 : i32
    %c0_i32_0 = arith.constant 0 : i32
    %c0_i32_1 = arith.constant 0 : i32
    return %c0_i32, %c0_i32_0 : i32, i32
  }
  func.func @transform_6(%arg0: i32) -> (i32, i32) {
    %c0_i32 = arith.constant 0 : i32
    %c0_i32_0 = arith.constant 0 : i32
    %c0_i32_1 = arith.constant 0 : i32
    return %c0_i32, %c0_i32_0 : i32, i32
  }
  func.func @transform_7(%arg0: i32) -> (i32, i32) {
    %c0_i32 = arith.constant 0 : i32
    %c0_i32_0 = arith.constant 0 : i32
    %c0_i32_1 = arith.constant 0 : i32
    return %c0_i32, %c0_i32_0 : i32, i32
  }
  func.func @transform_8(%arg0: i32) -> (i32, i32) {
    %c0_i32 = arith.constant 0 : i32
    %c0_i32_0 = arith.constant 0 : i32
    %c0_i32_1 = arith.constant 0 : i32
    return %c0_i32, %c0_i32_0 : i32, i32
  }
  func.func @transform_9(%arg0: i32) -> (i32, i32) {
    %c0_i32 = arith.constant 0 : i32
    %c0_i32_0 = arith.constant 0 : i32
    return %arg0, %c0_i32 : i32, i32
  }
}

module attributes {stable_mosaic.version = 11 : i64} {
  func.func @sae_kernel(%arg0: i32, %arg1: memref<8x200xf32, #tpu.memory_space<vmem>>, %arg2: memref<200x20xbf16, #tpu.memory_space<vmem>>, %arg3: memref<1x20xf32, #tpu.memory_space<vmem>>, %arg4: memref<20x10xbf16, #tpu.memory_space<vmem>>, %arg5: memref<1x10xf32, #tpu.memory_space<vmem>>, %arg6: memref<10x20xbf16, #tpu.memory_space<vmem>>, %arg7: memref<1x20xf32, #tpu.memory_space<vmem>>, %arg8: memref<20x200xbf16, #tpu.memory_space<vmem>>, %arg9: memref<1x200xf32, #tpu.memory_space<vmem>>, %arg10: memref<8x200xbf16, #tpu.memory_space<vmem>>) attributes {dimension_semantics = [#tpu.dimension_semantics<parallel>], iteration_bounds = array<i64: 1>, scalar_prefetch = 0 : i64, scratch_operands = 0 : i64, tpu.core_type = #tpu.core_type<tc>, window_params = [{transform_indices = @transform_0, window_bounds = array<i64: 8, 200>}, {pipeline_mode = #tpu.pipeline_mode<synchronous>, transform_indices = @transform_1, window_bounds = array<i64: 200, 20>}, {pipeline_mode = #tpu.pipeline_mode<synchronous>, transform_indices = @transform_2, window_bounds = array<i64: 1, 20>}, {pipeline_mode = #tpu.pipeline_mode<synchronous>, transform_indices = @transform_3, window_bounds = array<i64: 20, 10>}, {pipeline_mode = #tpu.pipeline_mode<synchronous>, transform_indices = @transform_4, window_bounds = array<i64: 1, 10>}, {pipeline_mode = #tpu.pipeline_mode<synchronous>, transform_indices = @transform_5, window_bounds = array<i64: 10, 20>}, {pipeline_mode = #tpu.pipeline_mode<synchronous>, transform_indices = @transform_6, window_bounds = array<i64: 1, 20>}, {pipeline_mode = #tpu.pipeline_mode<synchronous>, transform_indices = @transform_7, window_bounds = array<i64: 20, 200>}, {pipeline_mode = #tpu.pipeline_mode<synchronous>, transform_indices = @transform_8, window_bounds = array<i64: 1, 200>}, {transform_indices = @transform_9, window_bounds = array<i64: 8, 200>}]} {
    %c0 = arith.constant 0 : index
    %c0_0 = arith.constant 0 : index
    %0 = vector.load %arg1[%c0, %c0_0] : memref<8x200xf32, #tpu.memory_space<vmem>>, vector<8x200xf32>
    %1 = arith.truncf %0 : vector<8x200xf32> to vector<8x200xbf16>
    %c0_1 = arith.constant 0 : index
    %c0_2 = arith.constant 0 : index
    %2 = vector.load %arg2[%c0_1, %c0_2] : memref<200x20xbf16, #tpu.memory_space<vmem>>, vector<200x20xbf16>
    %cst = arith.constant dense<0.000000e+00> : vector<8x20xf32>
    %3 = tpu.matmul %1, %2, %cst {dimension_numbers = #tpu.dot_dimension_numbers<[1], [0], [0], [1], [0, 0, 1, 1], [], []>} : vector<8x200xbf16>, vector<200x20xbf16>, vector<8x20xf32> -> vector<8x20xf32>
    %c0_3 = arith.constant 0 : index
    %c0_4 = arith.constant 0 : index
    %4 = vector.load %arg3[%c0_3, %c0_4] : memref<1x20xf32, #tpu.memory_space<vmem>>, vector<1x20xf32>
    %5 = vector.broadcast %4 : vector<1x20xf32> to vector<8x20xf32>
    %6 = arith.addf %3, %5 : vector<8x20xf32>
    %7 = arith.negf %6 : vector<8x20xf32>
    %8 = math.exp %7 : vector<8x20xf32>
    %cst_5 = arith.constant 1.000000e+00 : f32
    %9 = vector.broadcast %cst_5 : f32 to vector<8x20xf32>
    %10 = arith.addf %9, %8 : vector<8x20xf32>
    %11 = arith.divf %9, %10 : vector<8x20xf32>
    %12 = arith.truncf %11 : vector<8x20xf32> to vector<8x20xbf16>
    %c0_6 = arith.constant 0 : index
    %c0_7 = arith.constant 0 : index
    %13 = vector.load %arg4[%c0_6, %c0_7] : memref<20x10xbf16, #tpu.memory_space<vmem>>, vector<20x10xbf16>
    %cst_8 = arith.constant dense<0.000000e+00> : vector<8x10xf32>
    %14 = tpu.matmul %12, %13, %cst_8 {dimension_numbers = #tpu.dot_dimension_numbers<[1], [0], [0], [1], [0, 0, 1, 1], [], []>} : vector<8x20xbf16>, vector<20x10xbf16>, vector<8x10xf32> -> vector<8x10xf32>
    %c0_9 = arith.constant 0 : index
    %c0_10 = arith.constant 0 : index
    %15 = vector.load %arg5[%c0_9, %c0_10] : memref<1x10xf32, #tpu.memory_space<vmem>>, vector<1x10xf32>
    %16 = vector.broadcast %15 : vector<1x10xf32> to vector<8x10xf32>
    %17 = arith.addf %14, %16 : vector<8x10xf32>
    %18 = arith.negf %17 : vector<8x10xf32>
    %19 = math.exp %18 : vector<8x10xf32>
    %cst_11 = arith.constant 1.000000e+00 : f32
    %20 = vector.broadcast %cst_11 : f32 to vector<8x10xf32>
    %21 = arith.addf %20, %19 : vector<8x10xf32>
    %22 = arith.divf %20, %21 : vector<8x10xf32>
    %23 = arith.truncf %22 : vector<8x10xf32> to vector<8x10xbf16>
    %c0_12 = arith.constant 0 : index
    %c0_13 = arith.constant 0 : index
    %24 = vector.load %arg6[%c0_12, %c0_13] : memref<10x20xbf16, #tpu.memory_space<vmem>>, vector<10x20xbf16>
    %cst_14 = arith.constant dense<0.000000e+00> : vector<8x20xf32>
    %25 = tpu.matmul %23, %24, %cst_14 {dimension_numbers = #tpu.dot_dimension_numbers<[1], [0], [0], [1], [0, 0, 1, 1], [], []>} : vector<8x10xbf16>, vector<10x20xbf16>, vector<8x20xf32> -> vector<8x20xf32>
    %c0_15 = arith.constant 0 : index
    %c0_16 = arith.constant 0 : index
    %26 = vector.load %arg7[%c0_15, %c0_16] : memref<1x20xf32, #tpu.memory_space<vmem>>, vector<1x20xf32>
    %27 = vector.broadcast %26 : vector<1x20xf32> to vector<8x20xf32>
    %28 = arith.addf %25, %27 : vector<8x20xf32>
    %29 = arith.negf %28 : vector<8x20xf32>
    %30 = math.exp %29 : vector<8x20xf32>
    %cst_17 = arith.constant 1.000000e+00 : f32
    %31 = vector.broadcast %cst_17 : f32 to vector<8x20xf32>
    %32 = arith.addf %31, %30 : vector<8x20xf32>
    %33 = arith.divf %31, %32 : vector<8x20xf32>
    %34 = arith.truncf %33 : vector<8x20xf32> to vector<8x20xbf16>
    %c0_18 = arith.constant 0 : index
    %c0_19 = arith.constant 0 : index
    %35 = vector.load %arg8[%c0_18, %c0_19] : memref<20x200xbf16, #tpu.memory_space<vmem>>, vector<20x200xbf16>
    %cst_20 = arith.constant dense<0.000000e+00> : vector<8x200xf32>
    %36 = tpu.matmul %34, %35, %cst_20 {dimension_numbers = #tpu.dot_dimension_numbers<[1], [0], [0], [1], [0, 0, 1, 1], [], []>} : vector<8x20xbf16>, vector<20x200xbf16>, vector<8x200xf32> -> vector<8x200xf32>
    %c0_21 = arith.constant 0 : index
    %c0_22 = arith.constant 0 : index
    %37 = vector.load %arg9[%c0_21, %c0_22] : memref<1x200xf32, #tpu.memory_space<vmem>>, vector<1x200xf32>
    %38 = vector.broadcast %37 : vector<1x200xf32> to vector<8x200xf32>
    %39 = arith.addf %36, %38 : vector<8x200xf32>
    %40 = arith.truncf %39 : vector<8x200xf32> to vector<8x200xbf16>
    %c0_23 = arith.constant 0 : index
    %c0_24 = arith.constant 0 : index
    %41 = vector.load %arg10[%c0_23, %c0_24] : memref<8x200xbf16, #tpu.memory_space<vmem>>, vector<8x200xbf16>
    tpu.vector_store %arg10[%c0_23, %c0_24], %40 {strides = array<i32>} : memref<8x200xbf16, #tpu.memory_space<vmem>>, vector<8x200xbf16>,
    return
  }
  func.func @transform_0(%arg0: i32) -> (i32, i32) {
    %c0_i32 = arith.constant 0 : i32
    %c0_i32_0 = arith.constant 0 : i32
    return %arg0, %c0_i32 : i32, i32
  }
  func.func @transform_1(%arg0: i32) -> (i32, i32) {
    %c0_i32 = arith.constant 0 : i32
    %c0_i32_0 = arith.constant 0 : i32
    %c0_i32_1 = arith.constant 0 : i32
    return %c0_i32, %c0_i32_0 : i32, i32
  }
  func.func @transform_2(%arg0: i32) -> (i32, i32) {
    %c0_i32 = arith.constant 0 : i32
    %c0_i32_0 = arith.constant 0 : i32
    %c0_i32_1 = arith.constant 0 : i32
    return %c0_i32, %c0_i32_0 : i32, i32
  }
  func.func @transform_3(%arg0: i32) -> (i32, i32) {
    %c0_i32 = arith.constant 0 : i32
    %c0_i32_0 = arith.constant 0 : i32
    %c0_i32_1 = arith.constant 0 : i32
    return %c0_i32, %c0_i32_0 : i32, i32
  }
  func.func @transform_4(%arg0: i32) -> (i32, i32) {
    %c0_i32 = arith.constant 0 : i32
    %c0_i32_0 = arith.constant 0 : i32
    %c0_i32_1 = arith.constant 0 : i32
    return %c0_i32, %c0_i32_0 : i32, i32
  }
  func.func @transform_5(%arg0: i32) -> (i32, i32) {
    %c0_i32 = arith.constant 0 : i32
    %c0_i32_0 = arith.constant 0 : i32
    %c0_i32_1 = arith.constant 0 : i32
    return %c0_i32, %c0_i32_0 : i32, i32
  }
  func.func @transform_6(%arg0: i32) -> (i32, i32) {
    %c0_i32 = arith.constant 0 : i32
    %c0_i32_0 = arith.constant 0 : i32
    %c0_i32_1 = arith.constant 0 : i32
    return %c0_i32, %c0_i32_0 : i32, i32
  }
  func.func @transform_7(%arg0: i32) -> (i32, i32) {
    %c0_i32 = arith.constant 0 : i32
    %c0_i32_0 = arith.constant 0 : i32
    %c0_i32_1 = arith.constant 0 : i32
    return %c0_i32, %c0_i32_0 : i32, i32
  }
  func.func @transform_8(%arg0: i32) -> (i32, i32) {
    %c0_i32 = arith.constant 0 : i32
    %c0_i32_0 = arith.constant 0 : i32
    %c0_i32_1 = arith.constant 0 : i32
    return %c0_i32, %c0_i32_0 : i32, i32
  }
  func.func @transform_9(%arg0: i32) -> (i32, i32) {
    %c0_i32 = arith.constant 0 : i32
    %c0_i32_0 = arith.constant 0 : i32
    return %arg0, %c0_i32 : i32, i32
  }
}

</mosaic_0001>

<bundles_post_ra>
// kernel: tpu_custom_call.1
= control target key start
LH: loop header
LB: loop body
LE: loop exit
PB: predicated region body
PF: predicated region fallthrough
CT: control target
= control target key end

     0   :  { %v561_v1 = vmov 0   ;;  %vm145_vm0 = vcmask 588800   ;;  %s725_s0 = inlined_call_operand.vmem [shape: f32[8,200], index: 0, kind: input, shape index: {}]   ;;  %s726_s1 = inlined_call_operand.vmem [shape: bf16[200,20], index: 1, kind: input, shape index: {}]   ;;  %s727_s2 = inlined_call_operand.vmem [shape: f32[1,20], index: 2, kind: input, shape index: {}]   ;;  %s728_s3 = inlined_call_operand.vmem [shape: bf16[20,10], index: 3, kind: input, shape index: {}]   ;;  %s729_s4 = inlined_call_operand.vmem [shape: f32[1,10], index: 4, kind: input, shape index: {}]   ;;  %s730_s5 = inlined_call_operand.vmem [shape: bf16[10,20], index: 5, kind: input, shape index: {}]   ;;  %s731_s6 = inlined_call_operand.vmem [shape: f32[1,20], index: 6, kind: input, shape index: {}]   ;;  %s732_s7 = inlined_call_operand.vmem [shape: bf16[20,200], index: 7, kind: input, shape index: {}]   ;;  %s733_s8 = inlined_call_operand.vmem [shape: f32[1,200], index: 8, kind: input, shape index: {}]   ;;  %s734_s9 = inlined_call_operand.hbm [shape: bf16[8,200], index: 9, kind: output, shape index: {}]  }
   0x1   :  { %v504_v0 = vld [vmem:[%s726_s1] sm:$0xff]   ;;  %153 = vmatprep.subr.bf16.mxu0 %v561_v1  ;;  %v505_v2 = vld [vmem:[%s726_s1 + $0x8] sm:$0xff]   ;;  %v506_v3 = vld [vmem:[%s726_s1 + $0x10] sm:$0xff]  }
   0x2   :  { %154 = vmatpush1.bf16.msra.mxu0 %v504_v0  ;;  %v507_v4 = vld [vmem:[%s726_s1 + $0x18] sm:$0xff]   ;;  %v35_v5 = vld [vmem:[%s725_s0 + $0x8] sm:$0xff]  ;;  %v508_v6 = vld [vmem:[%s726_s1 + $0x20] sm:$0xff]  }
   0x3   :  { %155 = vmatprep.subr.bf16.mxu0 %v561_v1  ;;  %v37_v7 = vpack.c.bf16 %v35_v5, %v35_v5 }
   0x5   :  { %462 = vmatprep.mubr.msk.bf16.mxu0 %vm145_vm0, %v37_v7 }
   0x6   :  { %156 = vmatpush1.bf16.msra.mxu0 %v505_v2 }
   0x7   :  { %157 = vmatprep.subr.bf16.mxu0 %v561_v1 }
   0xa   :  { %158 = vmatpush1.bf16.msra.mxu0 %v506_v3 }
   0xb   :  { %159 = vmatprep.subr.bf16.mxu0 %v561_v1 }
   0xe   :  { %160 = vmatpush1.bf16.msra.mxu0 %v507_v4 }
   0xf   :  { %161 = vmatprep.subr.bf16.mxu0 %v561_v1 }
  0x10   :  { %14 = vsyncpa [#allocation3], 0  ;;  %v509_v8 = vld [vmem:[%s726_s1 + $0x28] sm:$0xff]   ;;  %v510_v9 = vld [vmem:[%s726_s1 + $0x30] sm:$0xff]   ;;  %vm149_vm1 = vcmask 1043456   ;;  %vm223_vm2 = vcmask 1041408   ;;  %v348_v0 = vlaneseq }
  0x11   :  { %v511_v10 = vld [vmem:[%s726_s1 + $0x38] sm:$0xff]   ;;  %v512_v11 = vld [vmem:[%s726_s1 + $0x40] sm:$0xff]   ;;  %v513_v12 = vld [vmem:[%s726_s1 + $0x48] sm:$0xff]   ;;  %v562_v21 = vmov 0.0   ;;  %vm563_vm3 = vmmov 0   ;;  %vm219_vm4 = vcmask 162816  }
  0x12   :  { %162 = vmatpush1.bf16.msra.mxu0 %v508_v6  ;;  %v514_v13 = vld [vmem:[%s726_s1 + $0x50] sm:$0xff]   ;;  %v515_v14 = vld [vmem:[%s726_s1 + $0x58] sm:$0xff]   ;;  %v516_v15 = vld [vmem:[%s726_s1 + $0x60] ss:$0 sps:$4 sm:$0xff]   ;;  %486 = vmatprep.subr.bf16.mxu1 %v562_v21  ;;  %vm292_vm5 = vcmask 1044480   ;;  %vm288_vm6 = vcmask 80896  }
  0x13   :  { %163 = vmatprep.subr.bf16.mxu0 %v561_v1  ;;  %v34_v16 = vld [vmem:[%s725_s0] sm:$0xff]  ;;  %v151_v17 = vsel %vm149_vm1, %v516_v15, 0  ;;  %v518_v20 = vld [vmem:[%s728_s3 + $0x8] ss:$0 sps:$4 sm:$0x33]   ;;  %490 = vmatprep.mubr.msk.bf16.mxu1 %vm563_vm3, %v562_v21  ;;  %vm431_vm7 = vcmask 588804  }
  0x14   :  { %v36_v18 = vpack.c.bf16 %v34_v16, %v34_v16  ;;  %v517_v19 = vld [vmem:[%s728_s3] sm:$0xff]   ;;  %v225_v22 = vsel %vm223_vm2, %v518_v20, 0  ;;  %v345_v49 = vld [vmem:[%s732_s7 + $0x10] sm:$0x33]  ;;  %vm432_vm8 = vmor %vm431_vm7, %vm149_vm1 }
  0x15   :  { %487 = vmatpush3.bf16.msra.mxu1 %v517_v19  ;;  %v448_v23 = vld [vmem:[%s727_s2] ss:$0 sm:$0xff]  ;;  %v522_v47 = vld [vmem:[%s732_s7 + $0x4] ss:$8 sps:$4 sm:$0xff]   ;;  %v476_v50 = vcombine.high %v345_v49, %v345_v49  ;;  %v475_v51 = vcombine.low %v345_v49, %v345_v49 }
  0x16   :  { %164 = vmatpush1.bf16.msra.mxu0 %v509_v8  ;;  %488 = vmatprep.subr.bf16.mxu1 %v562_v21  ;;  %v519_v34 = vld [vmem:[%s730_s5] sm:$0x1f]  }
  0x17   :  { %165 = vmatprep.subr.bf16.mxu0 %v561_v1  ;;  %v294_v35 = vsel %vm292_vm5, %v519_v34, 0  ;;  %v464_v36 = vld [vmem:[%s729_s4] ss:$0 sm:$0xff]  ;;  %v377_v52 = vsel %vm223_vm2, %v475_v51, 0 }
  0x18   :  { %v520_v48 = vld [vmem:[%s732_s7] ss:$8 sps:$4 sm:$0xff]  }
  0x19   :  { %489 = vmatpush3.bf16.msra.mxu1 %v225_v22  ;;  %v469_v53 = vld [vmem:[%s731_s6] ss:$0 sm:$0xff]  ;;  %s564_s6 = smov [#allocation2]  }
  0x1a   :  { %166 = vmatpush1.bf16.msra.mxu0 %v510_v9  ;;  %494 = vmatprep.subr.bf16.mxu1 %v562_v21  ;;  %v346_v3 = vld [vmem:[%s733_s8] sm:$0x3]  ;;  %s440_s10 = sshll.u32 %s564_s6, 4  ;;  %s441_s10 = int_to_ptr.vmem [resolvable:$true] %s440_s10 }
  0x1b   :  { %167 = vmatprep.subr.bf16.mxu0 %v561_v1  ;;  %s537_s11 = scalar_lea.vmem %s441_s10, 128  ;;  %p542_p1 = scmp.lt.s32.totalorder %s441_s10, %s441_s10 }
  0x1c   :  { %p538_p0 = scmp.ne.s32.totalorder %s441_s10, %s537_s11  ;;  %p543_p2 = scmp.lt.s32.totalorder %s537_s11, %s537_s11 }
  0x1e   :  { %168 = vmatpush1.bf16.msra.mxu0 %v511_v10  ;;  %p544_p3 = por %p543_p2, %p542_p1 }
  0x1f   :  { %169 = vmatprep.subr.bf16.mxu0 %v561_v1 }
  0x20   :  { %p545_p4 = pnand %p544_p3, %p538_p0 }
  0x22   :  { %170 = vmatpush1.bf16.msra.mxu0 %v512_v11 }
  0x23   :  { %171 = vmatprep.subr.bf16.mxu0 %v561_v1 }
  0x26   :  { %172 = vmatpush1.bf16.msra.mxu0 %v513_v12 }
  0x27   :  { %173 = vmatprep.subr.bf16.mxu0 %v561_v1 }
  0x2a   :  { %174 = vmatpush1.bf16.msra.mxu0 %v514_v13 }
  0x2b   :  { %175 = vmatprep.subr.bf16.mxu0 %v561_v1 }
  0x2e   :  { %176 = vmatpush1.bf16.msra.mxu0 %v515_v14 }
  0x2f   :  { %177 = vmatprep.subr.bf16.mxu0 %v561_v1 }
  0x32   :  { %178 = vmatpush1.bf16.msra.mxu0 %v151_v17 }
  0x35   :  { %186 = vmatmul.mubr.bf16.vlgmr.msra.gmra.mrb[0].mxu0 %v36_v18 }
 0x108   :  { %v187_v24 = vpop.f32.mrb[0].mxu0 }
 0x109   :  { %v188_v25 = vadd.f32 %v448_v23, %v187_v24  ;;  %v189_v26 = vpop.f32.mrb[1].mxu0 }
 0x10a   :  { %v190_v27 = vpop.f32.mrb[2].mxu0 }
 0x10b   :  { %v463_v28 = vmul.f32 -1.442695, %v188_v25  ;;  %v191_v29 = vpop.f32.mrb[3].mxu0 }
 0x10d   :  { %525 = vpow2.f32 %v463_v28 }
 0x117   :  { %v526_v30 = vpop.eup %525 }
 0x118   :  { %v196_v31 = vadd.f32 1.0, %v526_v30 }
 0x11a   :  { %527 = vrcp.f32 %v196_v31 }
 0x124   :  { %v528_v32 = vpop.eup %527 }
 0x125   :  { %v199_v33 = vpack.c.bf16 %v528_v32, %v528_v32 }
 0x127   :  { %491 = vmatmul.mubr.msk.bf16.vlgmr.msra.gmra.mrb[0].mxu1 %vm219_vm4, %v199_v33 }
 0x128   :  { %496 = vmatprep.mubr.msk.bf16.mxu1 %vm563_vm3, %v562_v21  ;;  %495 = vmatpush3.bf16.msra.mxu1 %v294_v35 }
 0x129   :  { %382 = vmatprep.subr.bf16.mxu1 %v522_v47 }
 0x1fa   :  { %v261_v37 = vpop.f32.mrb[0].mxu1 }
 0x1fb   :  { %v262_v38 = vadd.f32 %v464_v36, %v261_v37  ;;  %v492_v39 = vpop.f32.mrb[1].mxu1 }
 0x1fc   :  { %v264_v40 = vpop.f32.mrb[2].mxu1 }
 0x1fd   :  { %v468_v41 = vmul.f32 -1.442695, %v262_v38  ;;  %v493_v42 = vpop.f32.mrb[3].mxu1 }
 0x1ff   :  { %529 = vpow2.f32 %v468_v41 }
 0x209   :  { %v530_v43 = vpop.eup %529 }
 0x20a   :  { %v270_v44 = vadd.f32 1.0, %v530_v43 }
 0x20c   :  { %531 = vrcp.f32 %v270_v44 }
 0x216   :  { %v532_v45 = vpop.eup %531 }
 0x217   :  { %v273_v46 = vpack.c.bf16 %v532_v45, %v532_v45 }
 0x219   :  { %497 = vmatmul.mubr.msk.bf16.vlgmr.msra.gmra.mrb[4].mxu1 %vm288_vm6, %v273_v46 }
 0x21a   :  { %414 = vmatprep.mubr.bf16.mxu1 %v561_v1  ;;  %383 = vmatpush1.bf16.msra.mxu1 %v520_v48  ;;  %v349_v1 = vshrl.u32 %v348_v0, 7 }
 0x21b   :  { %477 = vmatprep.subr.msk.bf16.mxu1 %vm223_vm2, %v476_v50 }
 0x21c   :  { %v350_v2 = vsub.s32 0, %v349_v1  ;;  %v354_v4 = vsub.s32 1, %v349_v1 }
 0x21e   :  { %385 = vmatpush1.bf16.msra.mxu1 %v377_v52  ;;  %v351_v5 = vrot.slane %v346_v3, %v350_v2  ;;  %v355_v6 = vrot.slane %v346_v3, %v354_v4 }
 0x2ec   :  { %v330_v54 = vpop.f32.mrb[4].mxu1 }
 0x2ed   :  { %v331_v55 = vadd.f32 %v469_v53, %v330_v54  ;;  %v498_v56 = vpop.f32.mrb[5].mxu1 }
 0x2ee   :  { %v333_v57 = vpop.f32.mrb[6].mxu1 }
 0x2ef   :  { %v472_v58 = vmul.f32 -1.442695, %v331_v55  ;;  %v499_v59 = vpop.f32.mrb[7].mxu1 }
 0x2f1   :  { %533 = vpow2.f32 %v472_v58 }
 0x2fb   :  { %v534_v60 = vpop.eup %533 }
 0x2fc   :  { %v339_v61 = vadd.f32 1.0, %v534_v60 }
 0x2fe   :  { %535 = vrcp.f32 %v339_v61 }
 0x308   :  { %v536_v62 = vpop.eup %535 }
 0x309   :  { %v342_v63 = vpack.c.bf16 %v536_v62, %v536_v62 }
 0x30b   :  { %478 = vmatmul.mubr.msk.bf16.vlgmr.msra.gmra.mrb[8].mxu1 %vm219_vm4, %v342_v63 }
 0x3de   :  { %v416_v7 = vpop.f32.mrb[8].mxu1 }
 0x3df   :  { %v417_v8 = vadd.f32 %v416_v7, %v351_v5  ;;  %v418_v9 = vpop.f32.mrb[9].mxu1 }
 0x3e0   :  { %v419_v10 = vadd.f32 %v418_v9, %v355_v6  ;;  %v420_v11 = vpop.f32.mrb[10].mxu1 }
 0x3e1   :  { %v421_v12 = vpop.f32.mrb[11].mxu1 }
 0x3e2   :  { %v480_v13 = vpack.c.bf16 %v419_v10, %v417_v8 }
 0x3e4   :  { %433 = vst.msk [vmem:[#allocation2] sm:$0xff] %vm432_vm8, %v480_v13 }
 0x3e5   :  { %548 = shalt.err (!%p545_p4)
}
 0x3e6   :  { %s549_s13 = scalar_lea.hbm %s734_s9, 128 }
 0x3e7   :  { %p550_p5 = scmp.ne.s32.totalorder %s734_s9, %s549_s13  ;;  %p553_p6 = scmp.lt.u32.totalorder %s549_s13, %s734_s9 }
 0x3e9   :  { %p555_p7 = pnand %p553_p6, %p550_p5 }
 0x3eb   :  { %558 = shalt.err (!%p555_p7)
}
 0x3ec   :  { %443 = dma.vmem_to_hbm [thread:$0]  %s441_s10, 128, %s734_s9, [#allocation3]  }
 0x3ed   :  { %559 = dma.done.wait [#allocation3], 128  }
 0x3ee   :  { %560 = vsyncadd [#allocation3], 4294967168 }
 0x3ef   :  { %447 = vsyncpa [#allocation3], 1 }

// kernel: tpu_custom_call.1
= control target key start
LH: loop header
LB: loop body
LE: loop exit
PB: predicated region body
PF: predicated region fallthrough
CT: control target
= control target key end

     0   :  { %v561_v1 = vmov 0   ;;  %vm145_vm0 = vcmask 588800   ;;  %s725_s0 = inlined_call_operand.vmem [shape: f32[8,200], index: 0, kind: input, shape index: {}]   ;;  %s726_s1 = inlined_call_operand.vmem [shape: bf16[200,20], index: 1, kind: input, shape index: {}]   ;;  %s727_s2 = inlined_call_operand.vmem [shape: f32[1,20], index: 2, kind: input, shape index: {}]   ;;  %s728_s3 = inlined_call_operand.vmem [shape: bf16[20,10], index: 3, kind: input, shape index: {}]   ;;  %s729_s4 = inlined_call_operand.vmem [shape: f32[1,10], index: 4, kind: input, shape index: {}]   ;;  %s730_s5 = inlined_call_operand.vmem [shape: bf16[10,20], index: 5, kind: input, shape index: {}]   ;;  %s731_s6 = inlined_call_operand.vmem [shape: f32[1,20], index: 6, kind: input, shape index: {}]   ;;  %s732_s7 = inlined_call_operand.vmem [shape: bf16[20,200], index: 7, kind: input, shape index: {}]   ;;  %s733_s8 = inlined_call_operand.vmem [shape: f32[1,200], index: 8, kind: input, shape index: {}]   ;;  %s734_s9 = inlined_call_operand.hbm [shape: bf16[8,200], index: 9, kind: output, shape index: {}]  }
   0x1   :  { %v504_v0 = vld [vmem:[%s726_s1] sm:$0xff]   ;;  %153 = vmatprep.subr.bf16.mxu0 %v561_v1  ;;  %v505_v2 = vld [vmem:[%s726_s1 + $0x8] sm:$0xff]   ;;  %v506_v3 = vld [vmem:[%s726_s1 + $0x10] sm:$0xff]  }
   0x2   :  { %154 = vmatpush1.bf16.msra.mxu0 %v504_v0  ;;  %v507_v4 = vld [vmem:[%s726_s1 + $0x18] sm:$0xff]   ;;  %v35_v5 = vld [vmem:[%s725_s0 + $0x8] sm:$0xff]  ;;  %v508_v6 = vld [vmem:[%s726_s1 + $0x20] sm:$0xff]  }
   0x3   :  { %155 = vmatprep.subr.bf16.mxu0 %v561_v1  ;;  %v37_v7 = vpack.c.bf16 %v35_v5, %v35_v5 }
   0x5   :  { %462 = vmatprep.mubr.msk.bf16.mxu0 %vm145_vm0, %v37_v7 }
   0x6   :  { %156 = vmatpush1.bf16.msra.mxu0 %v505_v2 }
   0x7   :  { %157 = vmatprep.subr.bf16.mxu0 %v561_v1 }
   0xa   :  { %158 = vmatpush1.bf16.msra.mxu0 %v506_v3 }
   0xb   :  { %159 = vmatprep.subr.bf16.mxu0 %v561_v1 }
   0xe   :  { %160 = vmatpush1.bf16.msra.mxu0 %v507_v4 }
   0xf   :  { %161 = vmatprep.subr.bf16.mxu0 %v561_v1 }
  0x10   :  { %14 = vsyncpa [#allocation3], 0  ;;  %v509_v8 = vld [vmem:[%s726_s1 + $0x28] sm:$0xff]   ;;  %v510_v9 = vld [vmem:[%s726_s1 + $0x30] sm:$0xff]   ;;  %vm149_vm1 = vcmask 1043456   ;;  %vm223_vm2 = vcmask 1041408   ;;  %v348_v0 = vlaneseq }
  0x11   :  { %v511_v10 = vld [vmem:[%s726_s1 + $0x38] sm:$0xff]   ;;  %v512_v11 = vld [vmem:[%s726_s1 + $0x40] sm:$0xff]   ;;  %v513_v12 = vld [vmem:[%s726_s1 + $0x48] sm:$0xff]   ;;  %v562_v21 = vmov 0.0   ;;  %vm563_vm3 = vmmov 0   ;;  %vm219_vm4 = vcmask 162816  }
  0x12   :  { %162 = vmatpush1.bf16.msra.mxu0 %v508_v6  ;;  %v514_v13 = vld [vmem:[%s726_s1 + $0x50] sm:$0xff]   ;;  %v515_v14 = vld [vmem:[%s726_s1 + $0x58] sm:$0xff]   ;;  %v516_v15 = vld [vmem:[%s726_s1 + $0x60] ss:$0 sps:$4 sm:$0xff]   ;;  %486 = vmatprep.subr.bf16.mxu1 %v562_v21  ;;  %vm292_vm5 = vcmask 1044480   ;;  %vm288_vm6 = vcmask 80896  }
  0x13   :  { %163 = vmatprep.subr.bf16.mxu0 %v561_v1  ;;  %v34_v16 = vld [vmem:[%s725_s0] sm:$0xff]  ;;  %v151_v17 = vsel %vm149_vm1, %v516_v15, 0  ;;  %v518_v20 = vld [vmem:[%s728_s3 + $0x8] ss:$0 sps:$4 sm:$0x33]   ;;  %490 = vmatprep.mubr.msk.bf16.mxu1 %vm563_vm3, %v562_v21  ;;  %vm431_vm7 = vcmask 588804  }
  0x14   :  { %v36_v18 = vpack.c.bf16 %v34_v16, %v34_v16  ;;  %v517_v19 = vld [vmem:[%s728_s3] sm:$0xff]   ;;  %v225_v22 = vsel %vm223_vm2, %v518_v20, 0  ;;  %v345_v49 = vld [vmem:[%s732_s7 + $0x10] sm:$0x33]  ;;  %vm432_vm8 = vmor %vm431_vm7, %vm149_vm1 }
  0x15   :  { %487 = vmatpush3.bf16.msra.mxu1 %v517_v19  ;;  %v448_v23 = vld [vmem:[%s727_s2] ss:$0 sm:$0xff]  ;;  %v522_v47 = vld [vmem:[%s732_s7 + $0x4] ss:$8 sps:$4 sm:$0xff]   ;;  %v476_v50 = vcombine.high %v345_v49, %v345_v49  ;;  %v475_v51 = vcombine.low %v345_v49, %v345_v49 }
  0x16   :  { %164 = vmatpush1.bf16.msra.mxu0 %v509_v8  ;;  %488 = vmatprep.subr.bf16.mxu1 %v562_v21  ;;  %v519_v34 = vld [vmem:[%s730_s5] sm:$0x1f]  }
  0x17   :  { %165 = vmatprep.subr.bf16.mxu0 %v561_v1  ;;  %v294_v35 = vsel %vm292_vm5, %v519_v34, 0  ;;  %v464_v36 = vld [vmem:[%s729_s4] ss:$0 sm:$0xff]  ;;  %v377_v52 = vsel %vm223_vm2, %v475_v51, 0 }
  0x18   :  { %v520_v48 = vld [vmem:[%s732_s7] ss:$8 sps:$4 sm:$0xff]  }
  0x19   :  { %489 = vmatpush3.bf16.msra.mxu1 %v225_v22  ;;  %v469_v53 = vld [vmem:[%s731_s6] ss:$0 sm:$0xff]  ;;  %s564_s6 = smov [#allocation2]  }
  0x1a   :  { %166 = vmatpush1.bf16.msra.mxu0 %v510_v9  ;;  %494 = vmatprep.subr.bf16.mxu1 %v562_v21  ;;  %v346_v3 = vld [vmem:[%s733_s8] sm:$0x3]  ;;  %s440_s10 = sshll.u32 %s564_s6, 4  ;;  %s441_s10 = int_to_ptr.vmem [resolvable:$true] %s440_s10 }
  0x1b   :  { %167 = vmatprep.subr.bf16.mxu0 %v561_v1  ;;  %s537_s11 = scalar_lea.vmem %s441_s10, 128  ;;  %p542_p1 = scmp.lt.s32.totalorder %s441_s10, %s441_s10 }
  0x1c   :  { %p538_p0 = scmp.ne.s32.totalorder %s441_s10, %s537_s11  ;;  %p543_p2 = scmp.lt.s32.totalorder %s537_s11, %s537_s11 }
  0x1e   :  { %168 = vmatpush1.bf16.msra.mxu0 %v511_v10  ;;  %p544_p3 = por %p543_p2, %p542_p1 }
  0x1f   :  { %169 = vmatprep.subr.bf16.mxu0 %v561_v1 }
  0x20   :  { %p545_p4 = pnand %p544_p3, %p538_p0 }
  0x22   :  { %170 = vmatpush1.bf16.msra.mxu0 %v512_v11 }
  0x23   :  { %171 = vmatprep.subr.bf16.mxu0 %v561_v1 }
  0x26   :  { %172 = vmatpush1.bf16.msra.mxu0 %v513_v12 }
  0x27   :  { %173 = vmatprep.subr.bf16.mxu0 %v561_v1 }
  0x2a   :  { %174 = vmatpush1.bf16.msra.mxu0 %v514_v13 }
  0x2b   :  { %175 = vmatprep.subr.bf16.mxu0 %v561_v1 }
  0x2e   :  { %176 = vmatpush1.bf16.msra.mxu0 %v515_v14 }
  0x2f   :  { %177 = vmatprep.subr.bf16.mxu0 %v561_v1 }
  0x32   :  { %178 = vmatpush1.bf16.msra.mxu0 %v151_v17 }
  0x35   :  { %186 = vmatmul.mubr.bf16.vlgmr.msra.gmra.mrb[0].mxu0 %v36_v18 }
 0x108   :  { %v187_v24 = vpop.f32.mrb[0].mxu0 }
 0x109   :  { %v188_v25 = vadd.f32 %v448_v23, %v187_v24  ;;  %v189_v26 = vpop.f32.mrb[1].mxu0 }
 0x10a   :  { %v190_v27 = vpop.f32.mrb[2].mxu0 }
 0x10b   :  { %v463_v28 = vmul.f32 -1.442695, %v188_v25  ;;  %v191_v29 = vpop.f32.mrb[3].mxu0 }
 0x10d   :  { %525 = vpow2.f32 %v463_v28 }
 0x117   :  { %v526_v30 = vpop.eup %525 }
 0x118   :  { %v196_v31 = vadd.f32 1.0, %v526_v30 }
 0x11a   :  { %527 = vrcp.f32 %v196_v31 }
 0x124   :  { %v528_v32 = vpop.eup %527 }
 0x125   :  { %v199_v33 = vpack.c.bf16 %v528_v32, %v528_v32 }
 0x127   :  { %491 = vmatmul.mubr.msk.bf16.vlgmr.msra.gmra.mrb[0].mxu1 %vm219_vm4, %v199_v33 }
 0x128   :  { %496 = vmatprep.mubr.msk.bf16.mxu1 %vm563_vm3, %v562_v21  ;;  %495 = vmatpush3.bf16.msra.mxu1 %v294_v35 }
 0x129   :  { %382 = vmatprep.subr.bf16.mxu1 %v522_v47 }
 0x1fa   :  { %v261_v37 = vpop.f32.mrb[0].mxu1 }
 0x1fb   :  { %v262_v38 = vadd.f32 %v464_v36, %v261_v37  ;;  %v492_v39 = vpop.f32.mrb[1].mxu1 }
 0x1fc   :  { %v264_v40 = vpop.f32.mrb[2].mxu1 }
 0x1fd   :  { %v468_v41 = vmul.f32 -1.442695, %v262_v38  ;;  %v493_v42 = vpop.f32.mrb[3].mxu1 }
 0x1ff   :  { %529 = vpow2.f32 %v468_v41 }
 0x209   :  { %v530_v43 = vpop.eup %529 }
 0x20a   :  { %v270_v44 = vadd.f32 1.0, %v530_v43 }
 0x20c   :  { %531 = vrcp.f32 %v270_v44 }
 0x216   :  { %v532_v45 = vpop.eup %531 }
 0x217   :  { %v273_v46 = vpack.c.bf16 %v532_v45, %v532_v45 }
 0x219   :  { %497 = vmatmul.mubr.msk.bf16.vlgmr.msra.gmra.mrb[4].mxu1 %vm288_vm6, %v273_v46 }
 0x21a   :  { %414 = vmatprep.mubr.bf16.mxu1 %v561_v1  ;;  %383 = vmatpush1.bf16.msra.mxu1 %v520_v48  ;;  %v349_v1 = vshrl.u32 %v348_v0, 7 }
 0x21b   :  { %477 = vmatprep.subr.msk.bf16.mxu1 %vm223_vm2, %v476_v50 }
 0x21c   :  { %v350_v2 = vsub.s32 0, %v349_v1  ;;  %v354_v4 = vsub.s32 1, %v349_v1 }
 0x21e   :  { %385 = vmatpush1.bf16.msra.mxu1 %v377_v52  ;;  %v351_v5 = vrot.slane %v346_v3, %v350_v2  ;;  %v355_v6 = vrot.slane %v346_v3, %v354_v4 }
 0x2ec   :  { %v330_v54 = vpop.f32.mrb[4].mxu1 }
 0x2ed   :  { %v331_v55 = vadd.f32 %v469_v53, %v330_v54  ;;  %v498_v56 = vpop.f32.mrb[5].mxu1 }
 0x2ee   :  { %v333_v57 = vpop.f32.mrb[6].mxu1 }
 0x2ef   :  { %v472_v58 = vmul.f32 -1.442695, %v331_v55  ;;  %v499_v59 = vpop.f32.mrb[7].mxu1 }
 0x2f1   :  { %533 = vpow2.f32 %v472_v58 }
 0x2fb   :  { %v534_v60 = vpop.eup %533 }
 0x2fc   :  { %v339_v61 = vadd.f32 1.0, %v534_v60 }
 0x2fe   :  { %535 = vrcp.f32 %v339_v61 }
 0x308   :  { %v536_v62 = vpop.eup %535 }
 0x309   :  { %v342_v63 = vpack.c.bf16 %v536_v62, %v536_v62 }
 0x30b   :  { %478 = vmatmul.mubr.msk.bf16.vlgmr.msra.gmra.mrb[8].mxu1 %vm219_vm4, %v342_v63 }
 0x3de   :  { %v416_v7 = vpop.f32.mrb[8].mxu1 }
 0x3df   :  { %v417_v8 = vadd.f32 %v416_v7, %v351_v5  ;;  %v418_v9 = vpop.f32.mrb[9].mxu1 }
 0x3e0   :  { %v419_v10 = vadd.f32 %v418_v9, %v355_v6  ;;  %v420_v11 = vpop.f32.mrb[10].mxu1 }
 0x3e1   :  { %v421_v12 = vpop.f32.mrb[11].mxu1 }
 0x3e2   :  { %v480_v13 = vpack.c.bf16 %v419_v10, %v417_v8 }
 0x3e4   :  { %433 = vst.msk [vmem:[#allocation2] sm:$0xff] %vm432_vm8, %v480_v13 }
 0x3e5   :  { %548 = shalt.err (!%p545_p4)
}
 0x3e6   :  { %s549_s13 = scalar_lea.hbm %s734_s9, 128 }
 0x3e7   :  { %p550_p5 = scmp.ne.s32.totalorder %s734_s9, %s549_s13  ;;  %p553_p6 = scmp.lt.u32.totalorder %s549_s13, %s734_s9 }
 0x3e9   :  { %p555_p7 = pnand %p553_p6, %p550_p5 }
 0x3eb   :  { %558 = shalt.err (!%p555_p7)
}
 0x3ec   :  { %443 = dma.vmem_to_hbm [thread:$0]  %s441_s10, 128, %s734_s9, [#allocation3]  }
 0x3ed   :  { %559 = dma.done.wait [#allocation3], 128  }
 0x3ee   :  { %560 = vsyncadd [#allocation3], 4294967168 }
 0x3ef   :  { %447 = vsyncpa [#allocation3], 1 }

</bundles_post_ra>
